<compile_context>
chip_gen: v7x
topology: tpu7x:2x2x1
jax: 0.10.0
libtpu: 0.0.40
codegen_flags: <defaults>
</compile_context>

<pallas_src>
import functools

import jax
import jax.numpy as jnp
from jax import lax
from jax.experimental import pallas as pl
from jax.experimental.pallas import tpu as pltpu

_LANES = 128
_MAX_ROWS_TILE = 256          # f32 accumulator = ROWS/8 vregs; 256 -> 32 vregs.
_MAX_HW_TILE_ELEMS = 16384    # caps the unrolled chunk loop at 128 chunks / step.


def _vmem_budget():
    """(per-input-buffer bytes, scoped-VMEM limit), gated per chip generation."""
    per_buffer = 8 * 1024 * 1024        # safe on v7x (64 MiB physical VMEM / TC)
    vmem_limit = 32 * 1024 * 1024
    try:
        info = pltpu.get_tpu_info()
        if getattr(info, "vmem_capacity_bytes", 0) >= 100 * 1024 * 1024:
            # v5e / v6e: 128 MiB physical VMEM -> deeper blocks shave step overhead.
            per_buffer = 16 * 1024 * 1024
            vmem_limit = 64 * 1024 * 1024
    except Exception:
        pass
    return per_buffer, vmem_limit


def _gap_small_kernel(x_ref, o_ref, *, inv_hw):
    # The whole (unpadded) HW extent is in the block: one reduce per row block.
    total = jnp.sum(x_ref[...].astype(jnp.float32), axis=-1, keepdims=True)
    o_ref[...] = (total * inv_hw).astype(o_ref.dtype)


def _gap_reduce_kernel(x_ref, o_ref, acc_ref, *, inv_hw, hw):
    k = pl.program_id(1)
    last = pl.num_programs(1) - 1
    hw_tile = x_ref.shape[-1]
    tail = hw % hw_tile           # static: valid lanes in the last (partial) k block

    @pl.when(k == 0)
    def _init():
        acc_ref[...] = jnp.zeros_like(acc_ref)

    def _accumulate(valid):
        # Per-lane VPU adds of static, lane-aligned 128-wide chunks. `valid` is the
        # static number of in-bounds lanes in this block; out-of-bounds lanes of a
        # partial edge block (unspecified VMEM contents) are skipped or masked to 0.
        acc = acc_ref[...]
        full_chunks = valid // _LANES
        rem = valid % _LANES
        for j in range(full_chunks):
            acc = acc + x_ref[:, j * _LANES:(j + 1) * _LANES].astype(jnp.float32)
        if rem:
            j = full_chunks
            chunk = x_ref[:, j * _LANES:(j + 1) * _LANES].astype(jnp.float32)
            lane = lax.broadcasted_iota(jnp.int32, chunk.shape, 1)
            acc = acc + jnp.where(lane < rem, chunk, 0.0)
        acc_ref[...] = acc

    if tail == 0:
        _accumulate(hw_tile)
    else:
        @pl.when(k != last)
        def _full():
            _accumulate(hw_tile)

        @pl.when(k == last)
        def _masked():
            _accumulate(tail)

    @pl.when(k == last)
    def _finalize():
        # Single cross-lane (XLU) reduce per row tile, then scale by 1/HW.
        total = jnp.sum(acc_ref[...], axis=-1, keepdims=True)
        o_ref[...] = (total * inv_hw).astype(o_ref.dtype)


def gap_forward(x, *, max_hw_tile_elems=None):
    """x: (N, C, H, W) -> (N, C, 1, 1), mean over H*W (matches torch `gap`)."""
    N, C, H, W = x.shape
    HW = H * W
    rows = N * C
    x_flat = x.reshape(rows, HW)
    itemsize = jnp.dtype(x.dtype).itemsize

    per_buffer_bytes, vmem_limit = _vmem_budget()

    # Row tile <= 256: either the full row extent (always a legal block dim) or 256
    # (sublane-aligned for every dtype) with a partial edge block.
    rows_tile = rows if rows <= _MAX_ROWS_TILE else _MAX_ROWS_TILE

    # HW tile: as large as the per-buffer VMEM budget allows, a multiple of 128 lanes.
    cap = per_buffer_bytes // max(rows_tile * itemsize, 1)
    cap = min(cap, _MAX_HW_TILE_ELEMS)
    if max_hw_tile_elems is not None:
        cap = min(cap, max_hw_tile_elems)
    hw_tile = max(_LANES, (cap // _LANES) * _LANES)

    out_shape = jax.ShapeDtypeStruct((rows, 1), x.dtype)
    cost = pl.CostEstimate(
        flops=rows * HW,
        transcendentals=0,
        bytes_accessed=rows * HW * itemsize + rows * itemsize,
    )

    if HW <= hw_tile:
        # Fast path: read the true contiguous HW extent (no lane padding from HBM),
        # single reduction step per row block.
        out = pl.pallas_call(
            functools.partial(_gap_small_kernel, inv_hw=1.0 / float(HW)),
            out_shape=out_shape,
            grid_spec=pltpu.PrefetchScalarGridSpec(
                num_scalar_prefetch=0,
                grid=(pl.cdiv(rows, rows_tile),),
                in_specs=[pl.BlockSpec((rows_tile, HW), lambda i: (i, 0))],
                out_specs=pl.BlockSpec((rows_tile, 1), lambda i: (i, 0)),
            ),
            compiler_params=pltpu.CompilerParams(
                dimension_semantics=("parallel",),
                vmem_limit_bytes=vmem_limit,
            ),
            cost_estimate=cost,
        )(x_flat)
    else:
        out = pl.pallas_call(
            functools.partial(_gap_reduce_kernel, inv_hw=1.0 / float(HW), hw=HW),
            out_shape=out_shape,
            grid_spec=pltpu.PrefetchScalarGridSpec(
                num_scalar_prefetch=0,
                grid=(pl.cdiv(rows, rows_tile), pl.cdiv(HW, hw_tile)),
                in_specs=[pl.BlockSpec((rows_tile, hw_tile), lambda i, k: (i, k))],
                out_specs=pl.BlockSpec((rows_tile, 1), lambda i, k: (i, 0)),
                scratch_shapes=[pltpu.VMEM((rows_tile, _LANES), jnp.float32)],
            ),
            compiler_params=pltpu.CompilerParams(
                dimension_semantics=("parallel", "arbitrary"),
                vmem_limit_bytes=vmem_limit,
            ),
            cost_estimate=cost,
        )(x_flat)

    return out.reshape(N, C, 1, 1)


def _ref_gap(x):
    N, C, H, W = x.shape
    return jnp.mean(x.reshape(N, C, H * W), axis=2).reshape(N, C, 1, 1)


if __name__ == "__main__":
    root = jax.random.PRNGKey(0)
    k0, k1, k2 = jax.random.split(root, 3)

    # Small shape consistent with the module: batch=2, channels=4, spatial=16x16
    # (fast path, lane-aligned HW).
    x = jax.random.normal(k0, (2, 4, 16, 16), dtype=jnp.float32)
    y = gap_forward(x)
    jax.block_until_ready(y)
    assert y.shape == (2, 4, 1, 1)
    assert jnp.allclose(y, _ref_gap(x), atol=1e-5, rtol=1e-5)

    # Non-aligned shape (fast path, unpadded non-128-multiple HW, odd row count).
    x2 = jax.random.normal(k1, (2, 6, 10, 13), dtype=jnp.float32)
    y2 = gap_forward(x2)
    jax.block_until_ready(y2)
    assert y2.shape == (2, 6, 1, 1)
    assert jnp.allclose(y2, _ref_gap(x2), atol=1e-5, rtol=1e-5)

    # Force the tiled-reduction path (ragged HW tail -> masked last k block).
    x3 = jax.random.normal(k2, (2, 4, 16, 17), dtype=jnp.float32)
    y3 = gap_forward(x3, max_hw_tile_elems=128)
    jax.block_until_ready(y3)
    assert y3.shape == (2, 4, 1, 1)
    assert jnp.allclose(y3, _ref_gap(x3), atol=1e-5, rtol=1e-5)

    print("KERNEL_OK")
</pallas_src>

<mosaic_0001>
module attributes {stable_mosaic.version = 11 : i64} {
  func.func @_gap_small_kernel(%arg0: i32, %arg1: memref<8x256xf32, #tpu.memory_space<vmem>>, %arg2: memref<8x1xf32, #tpu.memory_space<vmem>>) attributes {dimension_semantics = [#tpu.dimension_semantics<parallel>], iteration_bounds = array<i64: 1>, scalar_prefetch = 0 : i64, scratch_operands = 0 : i64, tpu.core_type = #tpu.core_type<tc>, window_params = [{transform_indices = @transform_0, window_bounds = array<i64: 8, 256>}, {transform_indices = @transform_1, window_bounds = array<i64: 8, 1>}]} {
    %c0 = arith.constant 0 : index
    %c0_0 = arith.constant 0 : index
    %0 = vector.load %arg1[%c0, %c0_0] : memref<8x256xf32, #tpu.memory_space<vmem>>, vector<8x256xf32>
    %cst = arith.constant dense<0.000000e+00> : vector<8xf32>
    %1 = vector.multi_reduction <add>, %0, %cst [1] : vector<8x256xf32> to vector<8xf32>
    %2 = vector.shape_cast %1 : vector<8xf32> to vector<8x1xf32>
    %cst_1 = arith.constant 3.906250e-03 : f32
    %3 = vector.broadcast %cst_1 : f32 to vector<8x1xf32>
    %4 = arith.mulf %2, %3 : vector<8x1xf32>
    %c0_2 = arith.constant 0 : index
    %c0_3 = arith.constant 0 : index
    %5 = vector.load %arg2[%c0_2, %c0_3] : memref<8x1xf32, #tpu.memory_space<vmem>>, vector<8x1xf32>
    tpu.vector_store %arg2[%c0_2, %c0_3], %4 {strides = array<i32>} : memref<8x1xf32, #tpu.memory_space<vmem>>, vector<8x1xf32>,
    return
  }
  func.func @transform_0(%arg0: i32) -> (i32, i32) {
    %c0_i32 = arith.constant 0 : i32
    %c0_i32_0 = arith.constant 0 : i32
    return %arg0, %c0_i32 : i32, i32
  }
  func.func @transform_1(%arg0: i32) -> (i32, i32) {
    %c0_i32 = arith.constant 0 : i32
    %c0_i32_0 = arith.constant 0 : i32
    return %arg0, %c0_i32 : i32, i32
  }
}

</mosaic_0001>

<bundles_post_ra>
// kernel: tpu_custom_call.1
= control target key start
LH: loop header
LB: loop body
LE: loop exit
PB: predicated region body
PF: predicated region fallthrough
CT: control target
= control target key end

     0   :  { %6 = vsyncpa [#allocation3], 0  ;;  %s58_s6 = smov [#allocation2]   ;;  %s84_s0 = inlined_call_operand.hbm [shape: f32[8,256], index: 0, kind: input, shape index: {}]   ;;  %s85_s1 = inlined_call_operand.vmem [shape: f32[8,1], index: 1, kind: output, shape index: {}]  }
   0x1   :  { %s13_s7 = sshll.u32 %s58_s6, 4  ;;  %s34_s10 = scalar_lea.hbm %s84_s0, 256  ;;  %s14_s7 = int_to_ptr.vmem [resolvable:$true] %s13_s7 }
   0x2   :  { %p35_p0 = scmp.ne.s32.totalorder %s84_s0, %s34_s10  ;;  %p38_p1 = scmp.lt.u32.totalorder %s34_s10, %s84_s0 }
   0x4   :  { %p40_p2 = pnand %p38_p1, %p35_p0 }
   0x6   :  { %43 = shalt.err (!%p40_p2)
}
   0x7   :  { %s44_s15 = scalar_lea.vmem %s14_s7, 256  ;;  %p49_p4 = scmp.lt.s32.totalorder %s14_s7, %s14_s7 }
   0x8   :  { %p45_p3 = scmp.ne.s32.totalorder %s14_s7, %s44_s15  ;;  %p50_p5 = scmp.lt.s32.totalorder %s44_s15, %s44_s15 }
   0xa   :  { %p51_p6 = por %p50_p5, %p49_p4 }
   0xc   :  { %p52_p7 = pnand %p51_p6, %p45_p3 }
   0xe   :  { %55 = shalt.err (!%p52_p7)
}
   0xf   :  { %16 = dma.hbm_to_vmem [thread:$0]  %s84_s0, 256, %s14_s7, [#allocation3]  }
  0x10   :  { %56 = dma.done.wait [#allocation3], 256  }
  0x11   :  { %57 = vsyncadd [#allocation3], 4294967040  ;;  %v20_v0 = vld [vmem:[#allocation2] sm:$0xff]  ;;  %v21_v1 = vld [vmem:[#allocation2 + $0x8] sm:$0xff]  ;;  %vm26_vm0 = vcmask 7168  }
  0x12   :  { %v22_v2 = vadd.f32 %v21_v1, %v20_v0 }
  0x14   :  { %23 = vadd.xlane.f32.xlu0 %v22_v2 }
  0xa1   :  { %v24_v3 = vpop.xlane.xlu0 %23 }
  0xa2   :  { %v25_v4 = vmul.f32 0.00390625, %v24_v3 }
  0xa4   :  { %27 = vst.msk [vmem:[%s85_s1] sm:$0xff] %vm26_vm0, %v25_v4 }
  0xa5   :  { %32 = vsyncpa [#allocation3], 1 }

</bundles_post_ra>
